<compile_context>
chip_gen: v7x
topology: tpu7x:2x2x1
jax: 0.10.0
libtpu: 0.0.40
codegen_flags: <defaults>
</compile_context>

<pallas_src>
import functools

import jax
import jax.numpy as jnp
from jax import lax
from jax.experimental import pallas as pl
from jax.experimental.pallas import tpu as pltpu


_LANES = 128
_MAX_TILE_ROWS = 1024        # 1024 * 128 * 4 B = 512 KiB per block


def _power_law(x, alpha, scale):
    """sign(x) * |x|**alpha (* scale only when it cannot be folded away)."""
    alpha = float(alpha)
    ax = jnp.abs(x)
    if alpha == 2.0:                         # forward() default: one VPU multiply
        y = x * ax
    elif alpha == 1.0:
        y = x
    elif alpha == 0.0:
        y = jnp.sign(x)                      # sign(x) * |x|**0  (torch: 0**0 == 1)
    elif alpha == int(alpha) and 0.0 < alpha <= 8.0:
        p = ax
        for _ in range(int(alpha) - 1):
            p = p * ax
        y = jnp.sign(x) * p
    else:                                    # general float alpha (EUP exp/log)
        y = jnp.sign(x) * jnp.power(ax, alpha)
    # A positive scale cancels exactly in the subsequent min-max normalization.
    if float(scale) <= 0.0:
        y = y * float(scale)
    return y


def _vreg_partials(y, tile_rows):
    """(tile_rows, 128) -> per-vreg (8, 128) min/max partials (VPU only)."""
    yv = y.reshape(tile_rows // 8, 8, _LANES)
    return jnp.min(yv, axis=0), jnp.max(yv, axis=0)


def _masked_vreg_partials(y, t_g, n, tile_rows):
    """Same as above but padded-tail elements are excluded via +/-inf.

    NOTE: the flat index is int32 and overflows for n > ~2.1e9 elements per
    channel (not a realistic image size here).
    """
    row = lax.broadcasted_iota(jnp.int32, (tile_rows, _LANES), 0)
    lane = lax.broadcasted_iota(jnp.int32, (tile_rows, _LANES), 1)
    idx = (t_g * tile_rows + row) * _LANES + lane
    valid = idx < n
    ymin = jnp.where(valid, y, jnp.inf).reshape(tile_rows // 8, 8, _LANES)
    ymax = jnp.where(valid, y, -jnp.inf).reshape(tile_rows // 8, 8, _LANES)
    return jnp.min(ymin, axis=0), jnp.max(ymax, axis=0)


def _stats_kernel(x_ref, min_ref, max_ref, *, alpha, scale, n, tile_rows,
                  tiles_per_chunk, total_tiles, first_masked_tile):
    """Pass 1: per-(chunk, channel) running min/max of the power-law noise."""
    ck = pl.program_id(0)                    # parallel chunk (v7x megacore)
    t = pl.program_id(2)                     # serial tile index within chunk
    t_g = ck * tiles_per_chunk + t           # global tile index
    is_first = t == 0

    y = _power_law(x_ref[0], alpha, scale)   # (tile_rows, 128)

    def accumulate(p_min, p_max):
        p_min = p_min[None, None]            # (1, 1, 8, 128)
        p_max = p_max[None, None]

        @pl.when(is_first)
        def _():
            min_ref[...] = p_min
            max_ref[...] = p_max

        @pl.when(jnp.logical_not(is_first))
        def _():
            min_ref[...] = jnp.minimum(min_ref[...], p_min)
            max_ref[...] = jnp.maximum(max_ref[...], p_max)

    if first_masked_tile >= total_tiles:
        # Static: no padding anywhere -> never pay for the mask.
        accumulate(*_vreg_partials(y, tile_rows))
    elif total_tiles == 1:
        # Static: the single tile is the boundary tile.
        accumulate(*_masked_vreg_partials(y, t_g, n, tile_rows))
    else:
        # Dynamic: only the boundary/past-boundary tiles pay for the mask.
        needs_mask = t_g >= first_masked_tile

        @pl.when(jnp.logical_not(needs_mask))
        def _():
            accumulate(*_vreg_partials(y, tile_rows))

        @pl.when(needs_mask)
        def _():
            accumulate(*_masked_vreg_partials(y, t_g, n, tile_rows))


def _normalize_kernel(norm_ref, x_ref, o_ref, *, alpha, scale):
    """Pass 2: recompute the power-law transform, normalize, write dense tile."""
    c = pl.program_id(1)
    y = _power_law(x_ref[...], alpha, scale)     # (1, tile_rows, 128)
    lo = norm_ref[c, 0]                          # per-channel min      (SMEM)
    inv = norm_ref[c, 1]                         # 1 / (max - min)      (SMEM)
    # clip is an exact-arithmetic no-op; it just pins the output to [0, 1].
    o_ref[...] = jnp.clip((y - lo) * inv, 0.0, 1.0)


def power_law_noise_white(batch_size, width, height, alpha=2.0, scale=1.0,
                          seed=0, channels_last=True):
    """Pallas implementation of PowerLawNoise.forward(noise_type='white').

    Returns a (batch_size, height, width, 3) float32 array in [0, 1]
    (or the channel-first (3, B, H, W) slab when channels_last=False, which
    skips the trailing NHWC transpose entirely).
    """
    n = batch_size * height * width                       # elements per channel
    rows = pl.cdiv(n, _LANES)
    tile_rows = min(_MAX_TILE_ROWS, ((rows + 7) // 8) * 8)   # multiple of 8
    num_tiles = pl.cdiv(rows, tile_rows)

    # v7x megacore balance: split the serial tile axis into an outer parallel
    # chunk axis (2 TCs share the reduction work).  No-op on v5e/v6e (1 TC).
    num_chunks = 2 if num_tiles >= 2 else 1
    tiles_per_chunk = pl.cdiv(num_tiles, num_chunks)
    total_tiles = num_chunks * tiles_per_chunk
    rows_pad = total_tiles * tile_rows
    padded_n = rows_pad * _LANES
    first_masked_tile = n // (tile_rows * _LANES)         # first tile w/ padding

    # Gaussian field generated once in XLA (in-kernel stateful PRNG is not
    # available in the interpret/CPU harness).  Distribution-only fidelity to
    # torch.randn, as before.  Padded tail holds extra normals that are masked
    # out of the pass-1 statistics and sliced away at the end.
    key = jax.random.PRNGKey(seed)
    x = jax.random.normal(key, (3, rows_pad, _LANES), dtype=jnp.float32)

    # ---- pass 1: per-channel min / max ---------------------------------------
    part_min, part_max = pl.pallas_call(
        functools.partial(_stats_kernel, alpha=alpha, scale=scale, n=n,
                          tile_rows=tile_rows, tiles_per_chunk=tiles_per_chunk,
                          total_tiles=total_tiles,
                          first_masked_tile=first_masked_tile),
        out_shape=(jax.ShapeDtypeStruct((num_chunks, 3, 8, _LANES), jnp.float32),
                   jax.ShapeDtypeStruct((num_chunks, 3, 8, _LANES), jnp.float32)),
        grid=(num_chunks, 3, tiles_per_chunk),
        in_specs=[pl.BlockSpec((1, tile_rows, _LANES),
                               lambda ck, c, t: (c, ck * tiles_per_chunk + t, 0))],
        out_specs=(pl.BlockSpec((1, 1, 8, _LANES), lambda ck, c, t: (ck, c, 0, 0)),
                   pl.BlockSpec((1, 1, 8, _LANES), lambda ck, c, t: (ck, c, 0, 0))),
        compiler_params=pltpu.CompilerParams(
            dimension_semantics=("parallel", "parallel", "arbitrary")),
    )(x)

    # Tiny (3,)-sized glue in XLA: fold partial stats, precompute reciprocals.
    ch_min = jnp.min(part_min, axis=(0, 2, 3))                    # (3,)
    ch_max = jnp.max(part_max, axis=(0, 2, 3))                    # (3,)
    rng = ch_max - ch_min
    inv = jnp.where(rng > 0, 1.0 / jnp.where(rng > 0, rng, 1.0), 0.0)
    norm = jnp.stack([ch_min, inv], axis=-1).astype(jnp.float32)  # (3, 2)

    # ---- pass 2: normalize, write lane-dense (3, rows_pad, 128) slab ---------
    # Large axis first so it is the one sharded across TCs on v7x.
    # (If profiling shows exposed output DMA, add pipeline_mode=pl.Buffered(3)
    #  to the out_spec below.)
    out_slab = pl.pallas_call(
        functools.partial(_normalize_kernel, alpha=alpha, scale=scale),
        out_shape=jax.ShapeDtypeStruct((3, rows_pad, _LANES), jnp.float32),
        grid=(total_tiles, 3),
        in_specs=[pl.BlockSpec(memory_space=pltpu.MemorySpace.SMEM),
                  pl.BlockSpec((1, tile_rows, _LANES), lambda t, c: (c, t, 0))],
        out_specs=pl.BlockSpec((1, tile_rows, _LANES), lambda t, c: (c, t, 0)),
        compiler_params=pltpu.CompilerParams(
            dimension_semantics=("parallel", "parallel")),
    )(norm, x)

    # Global min-max of the concatenated image: exact no-op after per-channel
    # min-max (each channel spans [0, 1]), so it is folded away here.

    # Glue: drop padding, reshape to channel-first (3, B, H, W).
    flat = out_slab.reshape(3, padded_n)[:, :n]
    img = flat.reshape(3, batch_size, height, width)
    if not channels_last:
        return img                                   # skip the NHWC transpose
    # TODO(synk): this transpose is the remaining extra HBM pass; consumers
    # that accept channel-first layout should call with channels_last=False.
    return jnp.transpose(img, (1, 2, 3, 0))          # (B, H, W, 3)


if __name__ == "__main__":
    # forward() takes only shape / seed parameters (no tensor inputs); derive a
    # deterministic integer seed from jax.random.PRNGKey(0).
    batch_size, height, width = 2, 16, 16
    seed = int(jax.random.randint(jax.random.PRNGKey(0), (), 0, 1_000_000))

    noise = power_law_noise_white(batch_size, width, height,
                                  alpha=2.0, scale=1.0, seed=seed)
    noise = jax.block_until_ready(noise)

    assert noise.shape == (batch_size, height, width, 3)
    assert noise.dtype == jnp.float32
    assert bool(jnp.isfinite(noise).all())
    assert float(noise.min()) >= 0.0 and float(noise.max()) <= 1.0
    # Each channel was min-max normalized over the whole (B, H, W) slab.
    ch_lo = jnp.min(noise, axis=(0, 1, 2))
    ch_hi = jnp.max(noise, axis=(0, 1, 2))
    assert bool(jnp.all(ch_lo < 1e-2)) and bool(jnp.all(ch_hi > 1.0 - 1e-2))
    print("KERNEL_OK")
</pallas_src>

<mosaic_0001>
module attributes {stable_mosaic.version = 11 : i64} {
  func.func @_stats_kernel(%arg0: i32, %arg1: i32, %arg2: i32, %arg3: memref<1x8x128xf32, #tpu.memory_space<vmem>>, %arg4: memref<1x1x8x128xf32, #tpu.memory_space<vmem>>, %arg5: memref<1x1x8x128xf32, #tpu.memory_space<vmem>>) attributes {dimension_semantics = [#tpu.dimension_semantics<parallel>, #tpu.dimension_semantics<parallel>, #tpu.dimension_semantics<arbitrary>], iteration_bounds = array<i64: 1, 3, 1>, scalar_prefetch = 0 : i64, scratch_operands = 0 : i64, tpu.core_type = #tpu.core_type<tc>, window_params = [{transform_indices = @transform_0, window_bounds = array<i64: 1, 8, 128>}, {transform_indices = @transform_1, window_bounds = array<i64: 1, 1, 8, 128>}, {transform_indices = @transform_2, window_bounds = array<i64: 1, 1, 8, 128>}]} {
    %c1_i32 = arith.constant 1 : i32
    %0 = arith.muli %arg0, %c1_i32 : i32
    %1 = arith.addi %0, %arg2 : i32
    %c0_i32 = arith.constant 0 : i32
    %2 = arith.cmpi eq, %arg2, %c0_i32 : i32
    %c0 = arith.constant 0 : index
    %c0_0 = arith.constant 0 : index
    %c0_1 = arith.constant 0 : index
    %3 = vector.load %arg3[%c0, %c0_0, %c0_1] : memref<1x8x128xf32, #tpu.memory_space<vmem>>, vector<1x8x128xf32>
    %4 = vector.shape_cast %3 : vector<1x8x128xf32> to vector<8x128xf32>
    %5 = math.absf %4 : vector<8x128xf32>
    %6 = arith.mulf %4, %5 : vector<8x128xf32>
    %7 = tpu.iota {dimensions = array<i32: 0>} : vector<8x128xi32>
    %8 = tpu.iota {dimensions = array<i32: 1>} : vector<8x128xi32>
    %c8_i32 = arith.constant 8 : i32
    %9 = arith.muli %1, %c8_i32 : i32
    %10 = vector.broadcast %9 : i32 to vector<8x128xi32>
    %11 = arith.addi %10, %7 : vector<8x128xi32>
    %c128_i32 = arith.constant 128 : i32
    %12 = vector.broadcast %c128_i32 : i32 to vector<8x128xi32>
    %13 = arith.muli %11, %12 : vector<8x128xi32>
    %14 = arith.addi %13, %8 : vector<8x128xi32>
    %c512_i32 = arith.constant 512 : i32
    %15 = vector.broadcast %c512_i32 : i32 to vector<8x128xi32>
    %16 = arith.cmpi slt, %14, %15 : vector<8x128xi32>
    %cst = arith.constant 0x7F800000 : f32
    %17 = vector.broadcast %cst : f32 to vector<8x128xf32>
    %18 = arith.select %16, %6, %17 : vector<8x128xi1>, vector<8x128xf32>
    %19 = vector.shape_cast %18 : vector<8x128xf32> to vector<1x8x128xf32>
    %cst_2 = arith.constant 0xFF800000 : f32
    %20 = vector.broadcast %cst_2 : f32 to vector<8x128xf32>
    %21 = arith.select %16, %6, %20 : vector<8x128xi1>, vector<8x128xf32>
    %22 = vector.shape_cast %21 : vector<8x128xf32> to vector<1x8x128xf32>
    %cst_3 = arith.constant dense<0x7F800000> : vector<8x128xf32>
    %23 = vector.multi_reduction <minimumf>, %19, %cst_3 [0] : vector<1x8x128xf32> to vector<8x128xf32>
    %cst_4 = arith.constant dense<0xFF800000> : vector<8x128xf32>
    %24 = vector.multi_reduction <maximumf>, %22, %cst_4 [0] : vector<1x8x128xf32> to vector<8x128xf32>
    %25 = vector.shape_cast %23 : vector<8x128xf32> to vector<1x1x8x128xf32>
    %26 = vector.shape_cast %24 : vector<8x128xf32> to vector<1x1x8x128xf32>
    %27 = arith.extui %2 : i1 to i32
    %c0_i32_5 = arith.constant 0 : i32
    %28 = arith.cmpi ne, %27, %c0_i32_5 : i32
    scf.if %28 {
      %c0_7 = arith.constant 0 : index
      %c0_8 = arith.constant 0 : index
      %c0_9 = arith.constant 0 : index
      %c0_10 = arith.constant 0 : index
      %32 = vector.load %arg4[%c0_7, %c0_8, %c0_9, %c0_10] : memref<1x1x8x128xf32, #tpu.memory_space<vmem>>, vector<1x1x8x128xf32>
      tpu.vector_store %arg4[%c0_7, %c0_8, %c0_9, %c0_10], %25 {strides = array<i32>} : memref<1x1x8x128xf32, #tpu.memory_space<vmem>>, vector<1x1x8x128xf32>,
      %c0_11 = arith.constant 0 : index
      %c0_12 = arith.constant 0 : index
      %c0_13 = arith.constant 0 : index
      %c0_14 = arith.constant 0 : index
      %33 = vector.load %arg5[%c0_11, %c0_12, %c0_13, %c0_14] : memref<1x1x8x128xf32, #tpu.memory_space<vmem>>, vector<1x1x8x128xf32>
      tpu.vector_store %arg5[%c0_11, %c0_12, %c0_13, %c0_14], %26 {strides = array<i32>} : memref<1x1x8x128xf32, #tpu.memory_space<vmem>>, vector<1x1x8x128xf32>,
    } else {
    }
    %true = arith.constant true
    %29 = arith.xori %2, %true : i1
    %30 = arith.extui %29 : i1 to i32
    %c0_i32_6 = arith.constant 0 : i32
    %31 = arith.cmpi ne, %30, %c0_i32_6 : i32
    scf.if %31 {
      %c0_7 = arith.constant 0 : index
      %c0_8 = arith.constant 0 : index
      %c0_9 = arith.constant 0 : index
      %c0_10 = arith.constant 0 : index
      %32 = vector.load %arg4[%c0_7, %c0_8, %c0_9, %c0_10] : memref<1x1x8x128xf32, #tpu.memory_space<vmem>>, vector<1x1x8x128xf32>
      %33 = arith.minimumf %32, %25 : vector<1x1x8x128xf32>
      %c0_11 = arith.constant 0 : index
      %c0_12 = arith.constant 0 : index
      %c0_13 = arith.constant 0 : index
      %c0_14 = arith.constant 0 : index
      %34 = vector.load %arg4[%c0_11, %c0_12, %c0_13, %c0_14] : memref<1x1x8x128xf32, #tpu.memory_space<vmem>>, vector<1x1x8x128xf32>
      tpu.vector_store %arg4[%c0_11, %c0_12, %c0_13, %c0_14], %33 {strides = array<i32>} : memref<1x1x8x128xf32, #tpu.memory_space<vmem>>, vector<1x1x8x128xf32>,
      %c0_15 = arith.constant 0 : index
      %c0_16 = arith.constant 0 : index
      %c0_17 = arith.constant 0 : index
      %c0_18 = arith.constant 0 : index
      %35 = vector.load %arg5[%c0_15, %c0_16, %c0_17, %c0_18] : memref<1x1x8x128xf32, #tpu.memory_space<vmem>>, vector<1x1x8x128xf32>
      %36 = arith.maximumf %35, %26 : vector<1x1x8x128xf32>
      %c0_19 = arith.constant 0 : index
      %c0_20 = arith.constant 0 : index
      %c0_21 = arith.constant 0 : index
      %c0_22 = arith.constant 0 : index
      %37 = vector.load %arg5[%c0_19, %c0_20, %c0_21, %c0_22] : memref<1x1x8x128xf32, #tpu.memory_space<vmem>>, vector<1x1x8x128xf32>
      tpu.vector_store %arg5[%c0_19, %c0_20, %c0_21, %c0_22], %36 {strides = array<i32>} : memref<1x1x8x128xf32, #tpu.memory_space<vmem>>, vector<1x1x8x128xf32>,
    } else {
    }
    return
  }
  func.func @transform_0(%arg0: i32, %arg1: i32, %arg2: i32) -> (i32, i32, i32) {
    %c1_i32 = arith.constant 1 : i32
    %0 = arith.muli %arg0, %c1_i32 : i32
    %1 = arith.addi %0, %arg2 : i32
    %c0_i32 = arith.constant 0 : i32
    %c0_i32_0 = arith.constant 0 : i32
    return %arg1, %1, %c0_i32 : i32, i32, i32
  }
  func.func @transform_1(%arg0: i32, %arg1: i32, %arg2: i32) -> (i32, i32, i32, i32) {
    %c0_i32 = arith.constant 0 : i32
    %c0_i32_0 = arith.constant 0 : i32
    %c0_i32_1 = arith.constant 0 : i32
    return %arg0, %arg1, %c0_i32, %c0_i32_0 : i32, i32, i32, i32
  }
  func.func @transform_2(%arg0: i32, %arg1: i32, %arg2: i32) -> (i32, i32, i32, i32) {
    %c0_i32 = arith.constant 0 : i32
    %c0_i32_0 = arith.constant 0 : i32
    %c0_i32_1 = arith.constant 0 : i32
    return %arg0, %arg1, %c0_i32, %c0_i32_0 : i32, i32, i32, i32
  }
}

</mosaic_0001>

<bundles_post_ra>
// kernel: tpu_custom_call.1
= control target key start
LH: loop header
LB: loop body
LE: loop exit
PB: predicated region body
PF: predicated region fallthrough
CT: control target
= control target key end

     0   :  { %8 = vsyncpa [#allocation3], 0  ;;  %s833_s0 = inlined_call_operand.hbm [shape: f32[3,8,128], index: 0, kind: input, shape index: {}]   ;;  %s834_s1 = inlined_call_operand.hbm [shape: f32[1,3,8,128], index: 1, kind: output, shape index: {0}]   ;;  %s835_s2 = inlined_call_operand.hbm [shape: f32[1,3,8,128], index: 2, kind: output, shape index: {1}]  }
   0x1   :  { %10 = vsyncpa [#allocation3 + $0x1], 0 }
   0x2   :  { %11 = vsyncpa [#allocation4], 0 }
   0x3   :  { %13 = vsyncpa [#allocation4 + $0x1], 0 }
   0x4   :  { %14 = vsyncpa [#allocation7], 0 }
   0x5   :  { %16 = vsyncpa [#allocation7 + $0x1], 0  ;;  %s634_s9 = smov 0   ;;  %s636_s10 = smov 0  }
   0x6   :  { %s638_s11 = smov 0   ;;  %s640_s12 = smov 0  }
   0x7   :  { %s642_s13 = smov 0   ;;  %s644_s14 = smov 0  }
   0x8 LB: > { %s387_s15 = sadd.s32 4294967295, %s614_s14   ;;  %s388_s16 = sadd.s32 4294967294, %s614_s14   ;;  %s614_s14 = sphi %s644_s14, %s22_s14   ;;  %s610_s13 = sphi %s642_s13, %s850_s13   ;;  %s606_s12 = sphi %s640_s12, %s849_s12   ;;  %s602_s11 = sphi %s638_s11, %s848_s11   ;;  %s598_s10 = sphi %s636_s10, %s847_s10   ;;  %s594_s9 = sphi %s634_s9, %s846_s9  }
   0x9   : > { %s37_s17 = sadd.s32 1, %s610_s13  ;;  %s52_s18 = sadd.s32 1, %s602_s11 }
   0xa   : > { %p39_p0 = scmp.ge.s32.totalorder %s37_s17, 3  ;;  %p59_p1 = scmp.ne.s32.totalorder %s602_s11, %s598_s10 }
   0xb   : > { %p60_p2 = scmp.eq.s32.totalorder %s614_s14, 0  ;;  %p65_p3 = scmp.ne.s32.totalorder %s598_s10, %s594_s9 }
   0xc   : > { %s852_s17 = smov (%p39_p0, %s37_s17), 0  ;;  %p66_p5 = scmp.eq.s32.totalorder %s387_s15, 0 }
   0xd   : > { %p675_p4 = por %p60_p2, %p59_p1  ;;  %s47_s20 = ssub.s32 %s610_s13, %s852_s17 }
   0xe   : > { %p91_p6 = scmp.eq.s32.totalorder %s387_s15, 2  ;;  %p50_p7 = scmp.eq.s32.totalorder %s47_s20, 0 }
   0xf   : > { %p681_p8 = por %p66_p5, %p65_p3  ;;  %p97_p10 = scmp.eq.s32.totalorder %s388_s16, 2 }
  0x10   : > { %p685_p9 = por %p91_p6, %p59_p1  ;;  %p420_p12 = scmp.lt.s32.totalorder %s614_s14, 3 }
  0x11   : > { %s690_s23 = scalar_select %p50_p7, %s602_s11, %s52_s18  }
  0x12   : > { %s839_s22 = scalar_select %p685_p9, 1, 0 }
  0x13   : > { %p692_p11 = por %p97_p10, %p65_p3  ;;  %s145_s25 = sand.u32 1, %s602_s11  }
  0x14   : > { %s391_s26 = sshll.u32 %s145_s25, 3  ;;  %s392_s27 = sshll.u32 %s610_s13, 7 }
  0x15   : > { %s840_s24 = scalar_select %p692_p11, 1, 0 }
  0x16   : > { %s702_s30 = scalar_lea.hbm %s833_s0, %s392_s27  ;;  %s149_s3 = scalar_lea.vmem [#allocation2], %s391_s26 }
  0x17   : > { %s158_s4 = sshll.u32 %s149_s3, 4  ;;  %p708_p13 = pnand %p420_p12, %p675_p4  ;;  %s704_s4 = int_to_ptr.vmem [resolvable:$true] %s158_s4 }
  0x18   : > { %s146_s6 = scalar_lea.sflag [#allocation3], %s145_s25  ;;  %s470_s7 = scalar_lea.hbm %s702_s30, 128 }
  0x19   : > { %p471_p2 = scmp.ne.s32.totalorder %s702_s30, %s470_s7  ;;  %p472_p3 = pneg %p708_p13 }
  0x1a   : > { %s475_s16 = scalar_lea.hbm %s833_s0, 384  ;;  %p476_p4 = scmp.lt.u32.totalorder %s702_s30, %s833_s0 }
  0x1b   : > { %p473_p5 = pnand %p472_p3, %p471_p2  ;;  %p477_p7 = scmp.lt.u32.totalorder %s475_s16, %s470_s7 }
  0x1c   : > { %p479_p12 = scmp.lt.u32.totalorder %s470_s7, %s702_s30 }
  0x1d   : > { %p474_p6 = pneg %p473_p5  ;;  %p478_p10 = por %p477_p7, %p476_p4 }
  0x1f   : > { %p480_p0 = por %p479_p12, %p478_p10 }
  0x21   : > { %p481_p1 = pnand %p480_p0, %p474_p6 }
  0x23   : > { %484 = shalt.err (!%p481_p1)
}
  0x24   : > { %s485_s20 = scalar_lea.vmem %s704_s4, 128  ;;  %s616_s25 = smov [#allocation2]  }
  0x25   : > { %p486_p2 = scmp.ne.s32.totalorder %s704_s4, %s485_s20  ;;  %s490_s26 = sshll.u32 %s616_s25, 4  ;;  %s491_s26 = int_to_ptr.vmem [resolvable:$false] %s490_s26 }
  0x26   : > { %s492_s27 = scalar_lea.vmem %s491_s26, 256  ;;  %p493_p9 = scmp.lt.s32.totalorder %s704_s4, %s491_s26 }
  0x27   : > { %p488_p5 = pnand %p486_p2, %p472_p3  ;;  %p494_p4 = scmp.lt.s32.totalorder %s492_s27, %s485_s20 }
  0x29   : > { %p489_p11 = pneg %p488_p5  ;;  %p495_p7 = por %p494_p4, %p493_p9 }
  0x2b   : > { %p496_p10 = pnand %p495_p7, %p489_p11 }
  0x2d   : > { %499 = shalt.err (!%p496_p10)
}
  0x2e   : > { %412 = dma.hbm_to_vmem [thread:$0]  (!%p708_p13), %s702_s30, 128, %s704_s4, %s146_s6  }
  0x2f   : > { %p842_p0 = scmp.lt.s32.totalorder %s614_s14, 4  ;;  %p843_p1 = scmp.ge.s32.totalorder %s614_s14, 1 }
  0x31   : > { %p164_p3 = pnand %p843_p1, %p842_p0 }
  0x32   : > { %s744_s28 = sand.u32 (!%p164_p3), 1, %s598_s10  }
  0x33   : > { %167 = sbr.rel (%p164_p3) target bundleno = 109 (0x6d), region = 24  ;;  %s394_s29 = sshll.u32 (!%p164_p3), %s744_s28, 3 }
  0x34   : > { %s170_s3 = scalar_lea.sflag (!%p164_p3), [#allocation3], %s744_s28  ;;  %s173_s7 = scalar_lea.vmem (!%p164_p3), [#allocation2], %s394_s29 }
  0x3a   : > { %581 = dma.done.wait (%p681_p8), %s170_s3, 128  }
  0x3b   : > { %583 = vsyncadd (%p681_p8), %s170_s3, 4294967168  ;;  %v205_v0 = vlaneseq  ;;  %v202_v5 = vld [vmem:[%s173_s7] sm:$0xff]  ;;  %s191_s30 = scalar_lea.vmem [#allocation5], %s394_s29  ;;  %s198_s5 = scalar_lea.vmem [#allocation6], %s394_s29 }
  0x3c   : > { %s253_s4 = sshll.u32 %s191_s30, 4  ;;  %s268_s6 = sshll.u32 %s198_s5, 4  ;;  %v203_v6 = vand.u32 2147483647, %v202_v5  ;;  %s753_s4 = int_to_ptr.vmem [resolvable:$true] %s253_s4  ;;  %s755_s6 = int_to_ptr.vmem [resolvable:$true] %s268_s6 }
  0x3d   : > { %v206_v1 = vshrl.u32 %v205_v0, 7  ;;  %v208_v2 = vand.u32 127, %v205_v0  ;;  %s399_s8 = sshll.u32 %s606_s12, 7  ;;  %s233_s20 = scalar_lea.sflag [#allocation4], %s744_s28 }
  0x3e   : > { %v204_v7 = vmul.f32 %v203_v6, %v202_v5  ;;  %s760_s16 = scalar_lea.hbm %s834_s1, %s399_s8  ;;  %s765_s12 = scalar_lea.hbm %s835_s2, %s399_s8 }
  0x3f   : > { %v212_v3 = vmul.u32 128, %v206_v1  ;;  %s500_s25 = scalar_lea.vmem %s753_s4, 128  ;;  %p844_p9 = scmp.ne.s32.totalorder %s839_s22, 0 }
  0x40   : > { %p501_p8 = scmp.ne.s32.totalorder %s753_s4, %s500_s25  ;;  %s617_s26 = smov [#allocation5]  }
  0x41   : > { %v213_v4 = vadd.s32 %v212_v3, %v208_v2  ;;  %s504_s27 = sshll.u32 %s617_s26, 4  ;;  %s505_s27 = int_to_ptr.vmem [resolvable:$false] %s504_s27 }
  0x42   : > { %p502_p11 = pnand %p501_p8, %p844_p9  ;;  %s506_s29 = scalar_lea.vmem %s505_s27, 256 }
  0x43   : > { %vm214_vm0 = vcmp.lt.s32.totalorder %v213_v4, 512  ;;  %p507_p6 = scmp.lt.s32.totalorder %s753_s4, %s505_s27  ;;  %p508_p12 = scmp.lt.s32.totalorder %s506_s29, %s500_s25 }
  0x44   : > { %v215_v8 = vsel %vm214_vm0, %v204_v7, inf  ;;  %v216_v9 = vsel %vm214_vm0, %v204_v7, -inf  ;;  %p503_p13 = pneg %p502_p11 }
  0x45   : > { %220 = vst [vmem:[%s191_s30] sm:$0xff] %v215_v8  ;;  %221 = vst [vmem:[%s198_s5] sm:$0xff] %v216_v9  ;;  %p509_p2 = por %p508_p12, %p507_p6 }
  0x47   : > { %p510_p5 = pnand %p509_p2, %p503_p13 }
  0x49   : > { %513 = shalt.err (!%p510_p5)
}
  0x4a   : > { %s514_s3 = scalar_lea.hbm %s760_s16, 128  ;;  %s518_s5 = scalar_lea.hbm %s834_s1, 384 }
  0x4b   : > { %p515_p4 = scmp.ne.s32.totalorder %s760_s16, %s514_s3  ;;  %p519_p0 = scmp.lt.u32.totalorder %s760_s16, %s834_s1 }
  0x4c   : > { %p520_p1 = scmp.lt.u32.totalorder %s518_s5, %s514_s3  ;;  %p522_p8 = scmp.lt.u32.totalorder %s514_s3, %s760_s16 }
  0x4d   : > { %p516_p7 = pnand %p515_p4, %p844_p9 }
  0x4e   : > { %p521_p3 = por %p520_p1, %p519_p0 }
  0x4f   : > { %p517_p10 = pneg %p516_p7 }
  0x50   : > { %p523_p11 = por %p522_p8, %p521_p3 }
  0x52   : > { %p524_p13 = pnand %p523_p11, %p517_p10 }
  0x54   : > { %527 = shalt.err (!%p524_p13)
}
  0x55   : > { %405 = dma.vmem_to_hbm [thread:$0]  (%p844_p9), %s753_s4, 128, %s760_s16, %s233_s20  }
  0x56   : > { %s238_s15 = scalar_lea.sflag [#allocation7], %s744_s28  ;;  %s528_s18 = scalar_lea.vmem %s755_s6, 128 }
  0x57   : > { %p529_p6 = scmp.ne.s32.totalorder %s755_s6, %s528_s18  ;;  %s618_s19 = smov [#allocation6]  }
  0x58   : > { %s532_s25 = sshll.u32 %s618_s19, 4  ;;  %s533_s25 = int_to_ptr.vmem [resolvable:$false] %s532_s25 }
  0x59   : > { %p530_p12 = pnand %p529_p6, %p844_p9  ;;  %s534_s26 = scalar_lea.vmem %s533_s25, 256 }
  0x5a   : > { %p535_p5 = scmp.lt.s32.totalorder %s755_s6, %s533_s25  ;;  %p536_p4 = scmp.lt.s32.totalorder %s534_s26, %s528_s18 }
  0x5b   : > { %p531_p2 = pneg %p530_p12 }
  0x5c   : > { %p537_p7 = por %p536_p4, %p535_p5 }
  0x5e   : > { %p538_p10 = pnand %p537_p7, %p531_p2 }
  0x60   : > { %541 = shalt.err (!%p538_p10)
}
  0x61   : > { %s542_s28 = scalar_lea.hbm %s765_s12, 128  ;;  %s546_s20 = scalar_lea.hbm %s835_s2, 384 }
  0x62   : > { %p543_p0 = scmp.ne.s32.totalorder %s765_s12, %s542_s28  ;;  %p547_p8 = scmp.lt.u32.totalorder %s765_s12, %s835_s2 }
  0x63   : > { %p548_p11 = scmp.lt.u32.totalorder %s546_s20, %s542_s28  ;;  %p550_p6 = scmp.lt.u32.totalorder %s542_s28, %s765_s12 }
  0x64   : > { %p544_p1 = pnand %p543_p0, %p844_p9 }
  0x65   : > { %p549_p13 = por %p548_p11, %p547_p8 }
  0x66   : > { %p545_p3 = pneg %p544_p1 }
  0x67   : > { %p551_p12 = por %p550_p6, %p549_p13 }
  0x69   : > { %p552_p2 = pnand %p551_p12, %p545_p3 }
  0x6b   : > { %555 = shalt.err (!%p552_p2)
}
  0x6c   : > { %406 = dma.vmem_to_hbm [thread:$0]  (%p844_p9), %s755_s6, 128, %s765_s12, %s238_s15  }
  0x6d PF: > { %p421_p5 = scmp.ge.s32.totalorder %s614_s14, 2  ;;  %s280_s3 = sand.u32 1, %s594_s9  }
  0x6e   : > { %p845_p4 = scmp.ne.s32.totalorder %s840_s24, 0  ;;  %s281_s7 = scalar_lea.sflag [#allocation4], %s280_s3 }
  0x70   : > { %p414_p7 = pnand %p421_p5, %p845_p4 }
  0x72   : > { %585 = dma.done.wait (!%p414_p7), %s281_s7, 128  }
  0x73   : > { %587 = vsyncadd (!%p414_p7), %s281_s7, 4294967168  ;;  %s290_s30 = scalar_lea.sflag [#allocation7], %s280_s3 }
  0x74   : > { %589 = dma.done.wait (!%p414_p7), %s290_s30, 128  }
  0x75   : > { %591 = vsyncadd (!%p414_p7), %s290_s30, 4294967168  ;;  %s22_s14 = sadd.s32 1, %s614_s14   ;;  %s846_s9 = smov %s598_s10 }
  0x76   : > { %p19_p10 = scmp.ge.s32.totalorder %s22_s14, 5   ;;  %s847_s10 = smov %s602_s11 }
  0x77   : > { %s848_s11 = smov %s690_s23  ;;  %s849_s12 = smov %s610_s13 }
  0x78   : > { %s850_s13 = smov %s852_s17  ;;  %21 = sbr.rel (!%p19_p10) target bundleno = 8 (0x8), region = 94 }
  0x7f   :  { %295 = vsyncpa [#allocation3], 1 }
  0x80   :  { %297 = vsyncpa [#allocation3 + $0x1], 1 }
  0x81   :  { %298 = vsyncpa [#allocation4], 1 }
  0x82   :  { %300 = vsyncpa [#allocation4 + $0x1], 1 }
  0x83   :  { %301 = vsyncpa [#allocation7], 1 }
  0x84   :  { %303 = vsyncpa [#allocation7 + $0x1], 1 }

</bundles_post_ra>
